<compile_context>
chip_gen: v5e
topology: v5e:2x2
jax: 0.10.0
libtpu: 0.0.40
codegen_flags: <defaults>
</compile_context>

<pallas_src>
import functools

import jax
import jax.numpy as jnp
from jax.experimental import pallas as pl
from jax.experimental.pallas import tpu as pltpu


def _round_up(x, m):
    return ((x + m - 1) // m) * m


# ---------------------------------------------------------------------------
# Pallas kernel: tiled MXU matmul (bf16 x bf16 -> f32 acc -> out_dtype)
# ---------------------------------------------------------------------------

def _matmul_kernel(a_ref, b_ref, o_ref, acc_ref):
    @pl.when(pl.program_id(2) == 0)
    def _():
        acc_ref[...] = jnp.zeros_like(acc_ref)

    acc_ref[...] += jnp.dot(a_ref[...], b_ref[...],
                            preferred_element_type=jnp.float32)

    @pl.when(pl.program_id(2) == pl.num_programs(2) - 1)
    def _():
        o_ref[...] = acc_ref[...].astype(o_ref.dtype)


def pallas_matmul(a, b, out_dtype=jnp.bfloat16, tm=512, tn=512,
                  k_single_max=2048):
    """a: (M, K), b: (K, N) -> (M, N) out_dtype.  bf16 MXU operands, f32
    accumulation in VMEM scratch.  Only K is ever zero-padded; M/N boundary
    blocks are ragged (masked stores) so no extra HBM pad/slice copies."""
    M, K = a.shape
    K2, N = b.shape
    assert K == K2
    a = a.astype(jnp.bfloat16)
    b = b.astype(jnp.bfloat16)

    # --- K (contraction): garbage along K would corrupt the accumulation, so
    #     it is either a single full-extent block or 128-aligned + zero-padded.
    if K <= k_single_max:
        tk, nk = K, 1
    else:
        nk = pl.cdiv(K, k_single_max)
        tk = _round_up(pl.cdiv(K, nk), 128)
        Kp = tk * nk
        if Kp != K:                       # rare: K > 2048 and not 128-aligned
            a = jnp.pad(a, ((0, 0), (0, Kp - K)))
            b = jnp.pad(b, ((0, Kp - K), (0, 0)))

    # --- M: full-extent when small, otherwise ragged boundary blocks. ---
    tm_eff = M if M <= tm else tm
    nm = pl.cdiv(M, tm_eff)

    # --- N: lane-dense (128-multiple) thanks to Cout padding in weight prep;
    #     small unaligned outputs (patch embeddings) use a full-extent block.
    if N % 128 == 0:
        tn_eff = min(tn, N)
    else:
        assert N <= 2 * tn, "wide unaligned Cout: pad it to 128 in weight prep"
        tn_eff = N
    nn = pl.cdiv(N, tn_eff)

    # VMEM budget (double-buffered operands + output + f32 accumulator).
    bytes_est = (2 * (tm_eff * tk * 2 + tk * tn_eff * 2
                      + tm_eff * tn_eff * jnp.dtype(out_dtype).itemsize)
                 + tm_eff * tn_eff * 4)
    vmem_limit = int(min(max(2 * bytes_est, 16 * 2 ** 20), 32 * 2 ** 20))

    return pl.pallas_call(
        _matmul_kernel,
        out_shape=jax.ShapeDtypeStruct((M, N), out_dtype),
        grid=(nm, nn, nk),
        in_specs=[pl.BlockSpec((tm_eff, tk), lambda i, j, k: (i, k)),
                  pl.BlockSpec((tk, tn_eff), lambda i, j, k: (k, j))],
        out_specs=pl.BlockSpec((tm_eff, tn_eff), lambda i, j, k: (i, j)),
        scratch_shapes=[pltpu.VMEM((tm_eff, tn_eff), jnp.float32)],
        compiler_params=pltpu.CompilerParams(
            dimension_semantics=("parallel", "parallel", "arbitrary"),
            vmem_limit_bytes=vmem_limit),
    )(a, b)


# ---------------------------------------------------------------------------
# Pallas kernels: GroupNorm (two-pass, HW-tiled) with fused residual + ReLU
# ---------------------------------------------------------------------------

def _gn_stats_kernel(x_ref, o_ref, *, thw, hw):
    t = pl.program_id(1)

    @pl.when(t == 0)
    def _():
        o_ref[...] = jnp.zeros_like(o_ref)

    x = x_ref[0].astype(jnp.float32)                        # (thw, Cp)
    if hw % thw != 0:                                       # ragged last tile
        row = jax.lax.broadcasted_iota(jnp.int32, (thw, 1), 0) + t * thw
        x = jnp.where(row < hw, x, 0.0)
    s = jnp.sum(x, axis=0, keepdims=True)                   # (1, Cp)
    ss = jnp.sum(x * x, axis=0, keepdims=True)              # (1, Cp)
    o_ref[0] += jnp.concatenate([s, ss], axis=0)            # (2, Cp)


def _gn_apply_kernel(*refs, relu, has_res):
    idx = 0
    x_ref = refs[idx]; idx += 1
    r_ref = None
    if has_res:
        r_ref = refs[idx]; idx += 1
    scale_ref, shift_ref, o_ref = refs[idx], refs[idx + 1], refs[idx + 2]

    y = x_ref[0].astype(jnp.float32) * scale_ref[0] + shift_ref[0]
    if has_res:
        y = y + r_ref[0].astype(jnp.float32)
    if relu:
        y = jnp.maximum(y, 0.0)
    o_ref[0] = y.astype(o_ref.dtype)


def group_norm(x_nhwc, weight, bias, num_groups, eps, relu=False,
               residual=None, out_dtype=jnp.bfloat16, hw_tile=1024):
    """GroupNorm on NHWC(-padded-channel) activations, tiled over HW.
    Optionally fuses `relu(gn(x) + residual)` (the gn3 + shortcut path).
    Channels beyond len(weight) are padding: stats ignore them and their
    output is forced to zero (scale = shift = 0)."""
    B, H, W, Cp = x_nhwc.shape
    C = int(weight.shape[0])                  # real (unpadded) channels
    G = num_groups
    Cg = C // G
    HW = H * W
    thw = HW if HW <= hw_tile else hw_tile
    n_hw = pl.cdiv(HW, thw)

    x3 = x_nhwc.reshape(B, HW, Cp)

    # pass 1: per-channel sum / sumsq, accumulated across HW tiles
    stats = pl.pallas_call(
        functools.partial(_gn_stats_kernel, thw=thw, hw=HW),
        out_shape=jax.ShapeDtypeStruct((B, 2, Cp), jnp.float32),
        grid=(B, n_hw),
        in_specs=[pl.BlockSpec((1, thw, Cp), lambda b, t: (b, t, 0))],
        out_specs=pl.BlockSpec((1, 2, Cp), lambda b, t: (b, 0, 0)),
        compiler_params=pltpu.CompilerParams(
            dimension_semantics=("parallel", "arbitrary")),
    )(x3)

    # tiny (B, G) glue: group stats -> per-channel scale / shift
    s = stats[:, 0, :C].reshape(B, G, Cg).sum(-1)
    ss = stats[:, 1, :C].reshape(B, G, Cg).sum(-1)
    n = float(HW * Cg)
    mean = s / n
    var = ss / n - mean * mean
    inv = jax.lax.rsqrt(var + eps)
    scale = weight[None, :].astype(jnp.float32) * jnp.repeat(inv, Cg, axis=1)
    shift = (bias[None, :].astype(jnp.float32)
             - jnp.repeat(mean, Cg, axis=1) * scale)
    if Cp > C:                                # zero out padded channels
        scale = jnp.pad(scale, ((0, 0), (0, Cp - C)))
        shift = jnp.pad(shift, ((0, 0), (0, Cp - C)))
    scale = scale.reshape(B, 1, Cp)
    shift = shift.reshape(B, 1, Cp)

    # pass 2: normalize (+ residual + ReLU), tiled over HW, bf16 out
    tile_spec = pl.BlockSpec((1, thw, Cp), lambda b, t: (b, t, 0))
    vec_spec = pl.BlockSpec((1, 1, Cp), lambda b, t: (b, 0, 0))
    inputs = [x3]
    specs = [tile_spec]
    if residual is not None:
        inputs.append(residual.reshape(B, HW, Cp))
        specs.append(tile_spec)
    inputs += [scale, shift]
    specs += [vec_spec, vec_spec]

    out = pl.pallas_call(
        functools.partial(_gn_apply_kernel, relu=relu,
                          has_res=residual is not None),
        out_shape=jax.ShapeDtypeStruct((B, HW, Cp), out_dtype),
        grid=(B, n_hw),
        in_specs=specs,
        out_specs=tile_spec,
        compiler_params=pltpu.CompilerParams(
            dimension_semantics=("parallel", "parallel")),
    )(*inputs)
    return out.reshape(B, H, W, Cp)


# ---------------------------------------------------------------------------
# Pallas kernel: fused SqueezeAndExciteFusionAdd  (x * sig_x + y * sig_y)
# ---------------------------------------------------------------------------

def _se_fuse_kernel(x_ref, y_ref, sx_ref, sy_ref, o_ref):
    o_ref[0] = (x_ref[0].astype(jnp.float32) * sx_ref[0]
                + y_ref[0].astype(jnp.float32) * sy_ref[0]).astype(o_ref.dtype)


def _se_scale(x_nhwc, se_p):
    """adaptive_avg_pool2d(x,1) -> 1x1 conv -> ReLU -> 1x1 conv -> sigmoid.
    The squeeze FCs have M = B rows: tiny GEMMs, so plain jnp.dot (a
    pallas_call here is pure launch overhead at <1% MXU row occupancy)."""
    Cp = x_nhwc.shape[-1]
    C = se_p['w1'].shape[0]
    pooled = jnp.mean(x_nhwc.astype(jnp.float32), axis=(1, 2))[:, :C]
    h = jnp.maximum(jnp.dot(pooled, se_p['w1']) + se_p['b1'], 0.0)
    s = jax.nn.sigmoid(jnp.dot(h, se_p['w2']) + se_p['b2'])
    if Cp > C:                                # pad channels -> scale 0
        s = jnp.pad(s, ((0, 0), (0, Cp - C)))
    return s


def se_fusion_add(x_nhwc, y_nhwc, p_rgb, p_depth, hw_tile=1024):
    sx = _se_scale(x_nhwc, p_rgb)
    sy = _se_scale(y_nhwc, p_depth)
    B, H, W, Cp = x_nhwc.shape
    HW = H * W
    thw = HW if HW <= hw_tile else hw_tile
    n_hw = pl.cdiv(HW, thw)
    tile_spec = pl.BlockSpec((1, thw, Cp), lambda b, t: (b, t, 0))
    vec_spec = pl.BlockSpec((1, 1, Cp), lambda b, t: (b, 0, 0))
    out = pl.pallas_call(
        _se_fuse_kernel,
        out_shape=jax.ShapeDtypeStruct((B, HW, Cp), jnp.bfloat16),
        grid=(B, n_hw),
        in_specs=[tile_spec, tile_spec, vec_spec, vec_spec],
        out_specs=tile_spec,
        compiler_params=pltpu.CompilerParams(
            dimension_semantics=("parallel", "parallel")),
    )(x_nhwc.reshape(B, HW, Cp), y_nhwc.reshape(B, HW, Cp),
      sx.reshape(B, 1, Cp), sy.reshape(B, 1, Cp))
    return out.reshape(B, H, W, Cp)


# ---------------------------------------------------------------------------
# Convolution = (hoisted, channel-padded weight prep) + im2col + Pallas matmul
# ---------------------------------------------------------------------------

def _pack_w(w_oihw_f32, pad_cin, pad_cout):
    """Pack to (kh*kw*cin_pad, cout_pad) bf16 with 128-padded channel dims so
    conv outputs are lane-dense (no masked partial stores); pad weights are
    exact zeros so padded channels stay identically zero through the net."""
    cout, cin, kh, kw = w_oihw_f32.shape
    cin_p = _round_up(cin, 128) if pad_cin else cin
    cout_p = _round_up(cout, 128) if pad_cout else cout
    w = jnp.pad(w_oihw_f32,
                ((0, cout_p - cout), (0, cin_p - cin), (0, 0), (0, 0)))
    w_mat = (w.transpose(2, 3, 1, 0)
             .reshape(kh * kw * cin_p, cout_p).astype(jnp.bfloat16))
    return {'w_mat': w_mat, 'kh': kh, 'kw': kw,
            'cin_pad': cin_p, 'cout': cout, 'cout_pad': cout_p}


def prep_std_conv(w_oihw, pad_cin=True, pad_cout=True):
    """StdConv2d weight: standardize (unbiased=False) over real weights, then
    pack with channel padding."""
    w = w_oihw.astype(jnp.float32)
    m = jnp.mean(w, axis=(1, 2, 3), keepdims=True)
    v = jnp.var(w, axis=(1, 2, 3), keepdims=True)
    w = (w - m) / jnp.sqrt(v + 1e-05)
    return _pack_w(w, pad_cin, pad_cout)


def prep_conv(w_oihw, pad_cin=True, pad_cout=True):
    return _pack_w(w_oihw.astype(jnp.float32), pad_cin, pad_cout)


def _im2col(x_nhwc, kh, kw, stride, padding):
    """Materialize conv patches (bf16).
    TODO(synk): replace with a haloed Pallas conv for 3x3 to avoid the kh*kw x
    duplication of activation HBM traffic."""
    B, H, W, C = x_nhwc.shape
    x = x_nhwc.astype(jnp.bfloat16)
    if padding:
        x = jnp.pad(x, ((0, 0), (padding, padding), (padding, padding), (0, 0)))
    Ho = (H + 2 * padding - kh) // stride + 1
    Wo = (W + 2 * padding - kw) // stride + 1
    if kh == 1 and kw == 1 and stride == 1:
        a = x.reshape(B * Ho * Wo, C)
    else:
        patches = []
        for i in range(kh):
            for j in range(kw):
                patches.append(
                    x[:, i:i + stride * (Ho - 1) + 1:stride,
                      j:j + stride * (Wo - 1) + 1:stride, :])
        a = jnp.concatenate(patches, axis=-1).reshape(B * Ho * Wo, kh * kw * C)
    return a, Ho, Wo


def conv2d_prepped(x_nhwc, wp, stride, padding, bias=None,
                   out_dtype=jnp.bfloat16):
    assert x_nhwc.shape[-1] == wp['cin_pad'], (x_nhwc.shape, wp['cin_pad'])
    a, Ho, Wo = _im2col(x_nhwc, wp['kh'], wp['kw'], stride, padding)
    out = pallas_matmul(a, wp['w_mat'], out_dtype=out_dtype)
    out = out.reshape(x_nhwc.shape[0], Ho, Wo, wp['cout_pad'])
    if bias is not None:
        out = out + bias.astype(out.dtype)
    return out


# ---------------------------------------------------------------------------
# FuseResNetV2 forward (dual stream + SE fusion)
# ---------------------------------------------------------------------------

def root_forward(p, x_nhwc):
    x = conv2d_prepped(x_nhwc, p['conv'], stride=2, padding=3)
    return group_norm(x, p['gn_w'], p['gn_b'], 32, 1e-6, relu=True)


def maxpool3x3s2(x_nhwc):
    # TODO(synk): MaxPool2d(3, stride=2) kept in plain JAX (lax.reduce_window).
    return jax.lax.reduce_window(x_nhwc, jnp.array(-jnp.inf, x_nhwc.dtype),
                                 jax.lax.max, (1, 3, 3, 1), (1, 2, 2, 1),
                                 'VALID')


def preact_bottleneck(x, p):
    if 'downsample' in p:
        residual = conv2d_prepped(x, p['downsample'], stride=p['stride'],
                                  padding=0)
        residual = group_norm(residual, p['gn_proj_w'], p['gn_proj_b'],
                              num_groups=int(p['gn_proj_w'].shape[0]),
                              eps=1e-5, relu=False)
    else:
        residual = x
    y = conv2d_prepped(x, p['conv1'], stride=1, padding=0)
    y = group_norm(y, p['gn1_w'], p['gn1_b'], 32, 1e-6, relu=True)
    y = conv2d_prepped(y, p['conv2'], stride=p['stride'], padding=1)
    y = group_norm(y, p['gn2_w'], p['gn2_b'], 32, 1e-6, relu=True)
    y = conv2d_prepped(y, p['conv3'], stride=1, padding=0)
    # gn3 + residual add + ReLU fused into the GN apply kernel.
    return group_norm(y, p['gn3_w'], p['gn3_b'], 32, 1e-6,
                      relu=True, residual=residual)


def fuse_resnet_forward(params, x_nchw, y_nchw):
    b, _, in_size, _ = x_nchw.shape
    x = jnp.transpose(x_nchw, (0, 2, 3, 1)).astype(jnp.bfloat16)  # -> NHWC
    y = jnp.transpose(y_nchw, (0, 2, 3, 1)).astype(jnp.bfloat16)

    x = root_forward(params['root'], x)
    y = root_forward(params['rootd'], y)
    x = se_fusion_add(x, y, params['se0']['rgb'], params['se0']['depth'])
    # features carry (tensor, real_channel_count) so padded channels can be
    # sliced off only at the module boundary.
    features = [(x, int(params['root']['gn_w'].shape[0]))]

    x = maxpool3x3s2(x)
    y = maxpool3x3s2(y)

    n_blocks = len(params['body'])
    for i in range(n_blocks - 1):
        for unit in params['body'][i]:
            x = preact_bottleneck(x, unit)
        for unit in params['bodyd'][i]:
            y = preact_bottleneck(y, unit)
        if i == 0:
            x = se_fusion_add(x, y, params['se1']['rgb'], params['se1']['depth'])
        if i == 1:
            x = se_fusion_add(x, y, params['se2']['rgb'], params['se2']['depth'])
        c_real = int(params['body'][i][-1]['gn3_w'].shape[0])
        right_size = int(in_size / 4 / (i + 1))
        if x.shape[1] != right_size:
            pad = right_size - x.shape[1]
            assert 0 < pad < 3, f'x {x.shape} should {right_size}'
            feat = jnp.zeros((b, right_size, right_size, x.shape[3]), x.dtype)
            feat = feat.at[:, :x.shape[1], :x.shape[2], :].set(x)
        else:
            feat = x
        features.append((feat, c_real))

    for unit in params['body'][-1]:
        x = preact_bottleneck(x, unit)
    for unit in params['bodyd'][-1]:
        y = preact_bottleneck(y, unit)
    x = se_fusion_add(x, y, params['se3']['rgb'], params['se3']['depth'])
    return x, y, features[::-1]


# ---------------------------------------------------------------------------
# Embeddings forward
# ---------------------------------------------------------------------------

def embeddings_forward(params, x_nchw, y_nchw):
    x, y, features = fuse_resnet_forward(params['hybrid'], x_nchw, y_nchw)

    pe, ped = params['patch_embeddings'], params['patch_embeddingsd']
    patch = pe['w']['kh']
    x = conv2d_prepped(x, pe['w'], stride=patch, padding=0, bias=pe['b'],
                       out_dtype=jnp.float32)
    y = conv2d_prepped(y, ped['w'], stride=patch, padding=0, bias=ped['b'],
                       out_dtype=jnp.float32)

    B, h, w, hidden = x.shape
    x = x.reshape(B, h * w, hidden)    # == flatten(2).transpose(-1,-2) in NCHW
    y = y.reshape(B, h * w, hidden)
    embx = x + params['position_embeddings']
    emby = y + params['position_embeddings']
    # Dropout: identity at inference.

    feats_nchw = [jnp.transpose(f[..., :c].astype(jnp.float32), (0, 3, 1, 2))
                  for f, c in features]
    return embx, emby, feats_nchw


# ---------------------------------------------------------------------------
# Deterministic parameter construction (weight prep hoisted out of forward)
# ---------------------------------------------------------------------------

def init_params(key, block_units=(1, 1, 1), width_factor=1, img_size=32,
                grid_size=(2, 2), hidden_size=64):
    width = int(64 * width_factor)
    keys = iter(jax.random.split(key, 2048))

    def rnd(shape, scale=0.1):
        return scale * jax.random.normal(next(keys), shape, jnp.float32)

    def conv_w(cout, cin, k):
        return rnd((cout, cin, k, k))

    def gn_wb(c):
        return 1.0 + rnd((c,)), rnd((c,))

    def make_root():
        w, b = gn_wb(width)
        return {'conv': prep_std_conv(conv_w(width, 3, 7), pad_cin=False),
                'gn_w': w, 'gn_b': b}

    def make_se(channels, reduction=16):
        cr = max(channels // reduction, 1)
        return {'w1': rnd((channels, cr)), 'b1': rnd((cr,)),
                'w2': rnd((cr, channels)), 'b2': rnd((channels,))}

    def make_se_fusion(channels):
        return {'rgb': make_se(channels), 'depth': make_se(channels)}

    def make_unit(cin, cout, cmid, stride):
        p = {'stride': stride}
        p['gn1_w'], p['gn1_b'] = gn_wb(cmid)
        p['conv1'] = prep_std_conv(conv_w(cmid, cin, 1))
        p['gn2_w'], p['gn2_b'] = gn_wb(cmid)
        p['conv2'] = prep_std_conv(conv_w(cmid, cmid, 3))
        p['gn3_w'], p['gn3_b'] = gn_wb(cout)
        p['conv3'] = prep_std_conv(conv_w(cout, cmid, 1))
        if stride != 1 or cin != cout:
            p['downsample'] = prep_std_conv(conv_w(cout, cin, 1))
            p['gn_proj_w'], p['gn_proj_b'] = gn_wb(cout)
        return p

    def make_body():
        cfgs = [(width, width * 4, width, 1, block_units[0]),
                (width * 4, width * 8, width * 2, 2, block_units[1]),
                (width * 8, width * 16, width * 4, 2, block_units[2])]
        body = []
        for cin, cout, cmid, stride, n in cfgs:
            units = [make_unit(cin, cout, cmid, stride)]
            for _ in range(2, n + 1):
                units.append(make_unit(cout, cout, cmid, 1))
            body.append(units)
        return body

    hybrid = {'root': make_root(), 'rootd': make_root(),
              'se0': make_se_fusion(width),
              'se1': make_se_fusion(width * 4),
              'se2': make_se_fusion(width * 8),
              'se3': make_se_fusion(width * 16),
              'body': make_body(), 'bodyd': make_body()}

    # hybrid mode: in_channels = width*16, patch kernel = stride = patch_size
    patch = img_size // 16 // grid_size[0]
    n_patches = (img_size // (patch * 16)) ** 2
    params = {
        'hybrid': hybrid,
        'patch_embeddings': {
            'w': prep_conv(conv_w(hidden_size, width * 16, patch),
                           pad_cout=False),
            'b': rnd((hidden_size,))},
        'patch_embeddingsd': {
            'w': prep_conv(conv_w(hidden_size, width * 16, patch),
                           pad_cout=False),
            'b': rnd((hidden_size,))},
        'position_embeddings': jnp.zeros((1, n_patches, hidden_size),
                                         jnp.float32),
    }
    return params


# ---------------------------------------------------------------------------

if __name__ == "__main__":
    key = jax.random.PRNGKey(0)
    k_params, k_x, k_y = jax.random.split(key, 3)

    img_size = 32
    block_units = (1, 1, 1)      # one PreActBottleneck per stage (small test)
    width_factor = 1             # width=64: SE fusion channels are 64/256/512/1024
    hidden_size = 64
    grid_size = (2, 2)           # -> patch_size = 1, n_patches = (32/16)^2 = 4

    params = init_params(k_params, block_units, width_factor, img_size,
                         grid_size, hidden_size)
    x = jax.random.normal(k_x, (2, 3, img_size, img_size), jnp.float32)  # NCHW
    y = jax.random.normal(k_y, (2, 3, img_size, img_size), jnp.float32)

    embx, emby, features = embeddings_forward(params, x, y)
    embx = jax.block_until_ready(embx)
    emby = jax.block_until_ready(emby)
    features = [jax.block_until_ready(f) for f in features]

    # sanity: shapes implied by the PyTorch forward
    assert embx.shape == (2, 4, hidden_size), embx.shape
    assert emby.shape == (2, 4, hidden_size), emby.shape
    assert features[0].shape == (2, 512, 4, 4), features[0].shape
    assert features[1].shape == (2, 256, 8, 8), features[1].shape
    assert features[2].shape == (2, 64, 16, 16), features[2].shape
    assert all(bool(jnp.isfinite(t).all()) for t in [embx, emby] + features)

    print("KERNEL_OK")
</pallas_src>

<mosaic_0001>
module attributes {stable_mosaic.version = 11 : i64} {
  func.func @_matmul_kernel(%arg0: i32, %arg1: i32, %arg2: i32, %arg3: memref<512x147xbf16, #tpu.memory_space<vmem>>, %arg4: memref<147x128xbf16, #tpu.memory_space<vmem>>, %arg5: memref<512x128xbf16, #tpu.memory_space<vmem>>, %arg6: memref<512x128xf32, #tpu.memory_space<vmem>>) attributes {dimension_semantics = [#tpu.dimension_semantics<parallel>, #tpu.dimension_semantics<parallel>, #tpu.dimension_semantics<arbitrary>], iteration_bounds = array<i64: 1, 1, 1>, scalar_prefetch = 0 : i64, scratch_operands = 1 : i64, tpu.core_type = #tpu.core_type<tc>, window_params = [{transform_indices = @transform_0, window_bounds = array<i64: 512, 147>}, {transform_indices = @transform_1, window_bounds = array<i64: 147, 128>}, {transform_indices = @transform_2, window_bounds = array<i64: 512, 128>}]} {
    %c0_i32 = arith.constant 0 : i32
    %0 = arith.cmpi eq, %arg2, %c0_i32 : i32
    %1 = arith.extui %0 : i1 to i32
    %c0_i32_0 = arith.constant 0 : i32
    %2 = arith.cmpi ne, %1, %c0_i32_0 : i32
    scf.if %2 {
      %cst_10 = arith.constant 0.000000e+00 : f32
      %12 = vector.broadcast %cst_10 : f32 to vector<512x128xf32>
      %c0_11 = arith.constant 0 : index
      %c0_12 = arith.constant 0 : index
      %13 = vector.load %arg6[%c0_11, %c0_12] : memref<512x128xf32, #tpu.memory_space<vmem>>, vector<512x128xf32>
      tpu.vector_store %arg6[%c0_11, %c0_12], %12 {strides = array<i32>} : memref<512x128xf32, #tpu.memory_space<vmem>>, vector<512x128xf32>,
    } else {
    }
    %c0 = arith.constant 0 : index
    %c0_1 = arith.constant 0 : index
    %3 = vector.load %arg6[%c0, %c0_1] : memref<512x128xf32, #tpu.memory_space<vmem>>, vector<512x128xf32>
    %c0_2 = arith.constant 0 : index
    %c0_3 = arith.constant 0 : index
    %4 = vector.load %arg3[%c0_2, %c0_3] : memref<512x147xbf16, #tpu.memory_space<vmem>>, vector<512x147xbf16>
    %c0_4 = arith.constant 0 : index
    %c0_5 = arith.constant 0 : index
    %5 = vector.load %arg4[%c0_4, %c0_5] : memref<147x128xbf16, #tpu.memory_space<vmem>>, vector<147x128xbf16>
    %cst = arith.constant dense<0.000000e+00> : vector<512x128xf32>
    %6 = tpu.matmul %4, %5, %cst {dimension_numbers = #tpu.dot_dimension_numbers<[1], [0], [0], [1], [0, 0, 1, 1], [], []>} : vector<512x147xbf16>, vector<147x128xbf16>, vector<512x128xf32> -> vector<512x128xf32>
    %7 = arith.addf %3, %6 : vector<512x128xf32>
    %c0_6 = arith.constant 0 : index
    %c0_7 = arith.constant 0 : index
    %8 = vector.load %arg6[%c0_6, %c0_7] : memref<512x128xf32, #tpu.memory_space<vmem>>, vector<512x128xf32>
    tpu.vector_store %arg6[%c0_6, %c0_7], %7 {strides = array<i32>} : memref<512x128xf32, #tpu.memory_space<vmem>>, vector<512x128xf32>,
    %c0_i32_8 = arith.constant 0 : i32
    %9 = arith.cmpi eq, %arg2, %c0_i32_8 : i32
    %10 = arith.extui %9 : i1 to i32
    %c0_i32_9 = arith.constant 0 : i32
    %11 = arith.cmpi ne, %10, %c0_i32_9 : i32
    scf.if %11 {
      %c0_10 = arith.constant 0 : index
      %c0_11 = arith.constant 0 : index
      %12 = vector.load %arg6[%c0_10, %c0_11] : memref<512x128xf32, #tpu.memory_space<vmem>>, vector<512x128xf32>
      %13 = arith.truncf %12 : vector<512x128xf32> to vector<512x128xbf16>
      %c0_12 = arith.constant 0 : index
      %c0_13 = arith.constant 0 : index
      %14 = vector.load %arg5[%c0_12, %c0_13] : memref<512x128xbf16, #tpu.memory_space<vmem>>, vector<512x128xbf16>
      tpu.vector_store %arg5[%c0_12, %c0_13], %13 {strides = array<i32>} : memref<512x128xbf16, #tpu.memory_space<vmem>>, vector<512x128xbf16>,
    } else {
    }
    return
  }
  func.func @transform_0(%arg0: i32, %arg1: i32, %arg2: i32) -> (i32, i32) {
    %c0_i32 = arith.constant 0 : i32
    return %arg0, %arg2 : i32, i32
  }
  func.func @transform_1(%arg0: i32, %arg1: i32, %arg2: i32) -> (i32, i32) {
    %c0_i32 = arith.constant 0 : i32
    return %arg2, %arg1 : i32, i32
  }
  func.func @transform_2(%arg0: i32, %arg1: i32, %arg2: i32) -> (i32, i32) {
    %c0_i32 = arith.constant 0 : i32
    return %arg0, %arg1 : i32, i32
  }
}

</mosaic_0001>

<bundles_post_ra>
// kernel: tpu_custom_call.1
= control target key start
LH: loop header
LB: loop body
LE: loop exit
PB: predicated region body
PF: predicated region fallthrough
CT: control target
= control target key end

     0   :  { %vm670_vm0 = vcmask 1040384   ;;  %vm671_vm1 = vcmask 1041408   ;;  %v1984_v4 = vmov 65535   ;;  %s2497_s0 = inlined_call_operand.vmem [shape: bf16[512,147], index: 0, kind: input, shape index: {}]   ;;  %s2498_s1 = inlined_call_operand.vmem [shape: bf16[147,128], index: 1, kind: input, shape index: {}]   ;;  %s2499_s2 = inlined_call_operand.hbm [shape: bf16[512,128], index: 2, kind: output, shape index: {}]  }
   0x1   :  { %v1751_v0 = vld [vmem:[%s2498_s1 + $0x38] sm:$0xff]  ;;  %v227_v1 = vld [vmem:[%s2498_s1 + $0x48] sm:$0x3]  ;;  %v1750_v3 = vld [vmem:[%s2498_s1 + $0x30] sm:$0xff]  ;;  %v672_v5 = vsel %vm670_vm0, 4294967295, %v1984_v4 }
   0x2   :  { %v553_v2 = vunpack.c.l.b16 %v227_v1  ;;  %677 = vmatpush.bf16.msra.mxu0 %v1751_v0  ;;  %1944 = vmatpush.bf16.msra.mxu2 %v1751_v0  ;;  %v673_v7 = vsel %vm671_vm1, %v672_v5, 0  ;;  %v1749_v9 = vld [vmem:[%s2498_s1 + $0x28] sm:$0xff]  ;;  %v1752_v10 = vld [vmem:[%s2498_s1 + $0x40] sm:$0xff] }
   0x3   :  { %v1680_v11 = vld [vmem:[%s2497_s0 + $0x4] sm:$0xf]  ;;  %v1360_v12 = vld [vmem:[%s2497_s0 + $0x8] sm:$0xf0] }
   0x4   :  { %v563_v6 = vpack.c.b16 %v553_v2, %v553_v2 }
   0x6   :  { %v675_v8 = vand.u32 %v673_v7, %v563_v6  ;;  %678 = vmatpush.bf16.msra.mxu0 %v1750_v3  ;;  %1945 = vmatpush.bf16.msra.mxu2 %v1750_v3 }
   0x8   :  { %852 = vmatpush.bf16.msra.mxu1 %v675_v8  ;;  %1952 = vmatpush.bf16.msra.mxu3 %v675_v8 }
   0x9   :  { %7 = vsyncpa [#allocation4], 0  ;;  %v1714_v13 = vld [vmem:[%s2497_s0 + $0x114] sm:$0xf]  ;;  %v1496_v14 = vld [vmem:[%s2497_s0 + $0x118] sm:$0xf0]  ;;  %v1363_v15 = vor.u32 %v1680_v11, %v1360_v12 }
   0xa   :  { %679 = vmatpush.bf16.msra.mxu0 %v1749_v9  ;;  %1946 = vmatpush.bf16.msra.mxu2 %v1749_v9  ;;  %v1748_v16 = vld [vmem:[%s2498_s1 + $0x20] sm:$0xff]  ;;  %vm573_vm2 = vcmask 154624   ;;  %v1499_v17 = vor.u32 %v1714_v13, %v1496_v14  ;;  %v1747_v18 = vld [vmem:[%s2498_s1 + $0x18] sm:$0xff]  ;;  %v1746_v19 = vld [vmem:[%s2498_s1 + $0x10] sm:$0xff]  ;;  %s1344_s27 = sshll.u32 %s2499_s2, 4  ;;  %s1986_s28 = smov 64   ;;  %s1345_s27 = int_to_ptr.hbm [resolvable:$true] %s1344_s27 }
   0xb   :  { %v1745_v20 = vld [vmem:[%s2498_s1 + $0x8] sm:$0xff]  ;;  %v1682_v21 = vld [vmem:[%s2497_s0 + $0x14] sm:$0xf]  ;;  %v1368_v22 = vld [vmem:[%s2497_s0 + $0x18] sm:$0xf0]  ;;  %s1987_s29 = smov 4  }
   0xc   :  { %853 = vmatpush.bf16.msra.mxu1 %v1752_v10  ;;  %1953 = vmatpush.bf16.msra.mxu3 %v1752_v10  ;;  %v1716_v23 = vld [vmem:[%s2497_s0 + $0x124] sm:$0xf]  ;;  %v1504_v24 = vld [vmem:[%s2497_s0 + $0x128] sm:$0xf0]  ;;  %v1371_v25 = vor.u32 %v1682_v21, %v1368_v22  ;;  %v1358_v27 = vld [vmem:[%s2497_s0] sm:$0xf] }
   0xd   :  { %v1744_v26 = vld [vmem:[%s2498_s1] sm:$0xff]  ;;  %v1681_v28 = vld [vmem:[%s2497_s0 + $0x4] sm:$0xf0]  ;;  %v1507_v31 = vor.u32 %v1716_v23, %v1504_v24  ;;  %v1376_v35 = vld [vmem:[%s2497_s0 + $0x28] sm:$0xf0] }
   0xe   :  { %680 = vmatpush.bf16.msra.mxu0 %v1748_v16  ;;  %1947 = vmatpush.bf16.msra.mxu2 %v1748_v16  ;;  %v1486_v29 = vld [vmem:[%s2497_s0 + $0x100] sm:$0xf]  ;;  %v1713_v30 = vld [vmem:[%s2497_s0 + $0x104] sm:$0xf0]  ;;  %v1359_v32 = vor.u32 %v1681_v28, %v1358_v27  ;;  %v1684_v34 = vld [vmem:[%s2497_s0 + $0x24] sm:$0xf] }
   0xf   :  { %1648 = vmatmul.msk.bf16.vlgmr.msra.gmra.mxu1 %vm573_vm2, %v1363_v15  ;;  %1665 = vmatmul.msk.bf16.vlgmr.msra.gmra.mxu3 %vm573_vm2, %v1499_v17  ;;  %v1487_v33 = vor.u32 %v1713_v30, %v1486_v29  ;;  %v1718_v36 = vld [vmem:[%s2497_s0 + $0x134] sm:$0xf]  ;;  %v1512_v37 = vld [vmem:[%s2497_s0 + $0x138] sm:$0xf0]  ;;  %v1379_v38 = vor.u32 %v1684_v34, %v1376_v35  ;;  %v1366_v39 = vld [vmem:[%s2497_s0 + $0x10] sm:$0xf] }
  0x10   :  { %v1683_v40 = vld [vmem:[%s2497_s0 + $0x14] sm:$0xf0]  ;;  %v1494_v41 = vld [vmem:[%s2497_s0 + $0x110] sm:$0xf]  ;;  %v1515_v43 = vor.u32 %v1718_v36, %v1512_v37  ;;  %v1686_v46 = vld [vmem:[%s2497_s0 + $0x34] sm:$0xf] }
  0x11   :  { %v1715_v42 = vld [vmem:[%s2497_s0 + $0x114] sm:$0xf0]  ;;  %v1367_v44 = vor.u32 %v1683_v40, %v1366_v39  ;;  %v1384_v47 = vld [vmem:[%s2497_s0 + $0x38] sm:$0xf0]  ;;  %v1720_v48 = vld [vmem:[%s2497_s0 + $0x144] sm:$0xf] }
  0x12   :  { %681 = vmatpush.bf16.msra.mxu0 %v1747_v18  ;;  %1948 = vmatpush.bf16.msra.mxu2 %v1747_v18  ;;  %v1495_v45 = vor.u32 %v1715_v42, %v1494_v41  ;;  %v1520_v49 = vld [vmem:[%s2497_s0 + $0x148] sm:$0xf0]  ;;  %v1387_v50 = vor.u32 %v1686_v46, %v1384_v47  ;;  %v1374_v51 = vld [vmem:[%s2497_s0 + $0x20] sm:$0xf]  ;;  %v1685_v52 = vld [vmem:[%s2497_s0 + $0x24] sm:$0xf0] }
  0x13   :  { %v1502_v53 = vld [vmem:[%s2497_s0 + $0x120] sm:$0xf]  ;;  %v1717_v54 = vld [vmem:[%s2497_s0 + $0x124] sm:$0xf0]  ;;  %v1523_v55 = vor.u32 %v1720_v48, %v1520_v49  ;;  %v1375_v56 = vor.u32 %v1685_v52, %v1374_v51  ;;  %v1688_v58 = vld [vmem:[%s2497_s0 + $0x44] sm:$0xf] }
  0x14   :  { %v1503_v57 = vor.u32 %v1717_v54, %v1502_v53  ;;  %v1392_v59 = vld [vmem:[%s2497_s0 + $0x48] sm:$0xf0]  ;;  %v1722_v60 = vld [vmem:[%s2497_s0 + $0x154] sm:$0xf]  ;;  %v1528_v61 = vld [vmem:[%s2497_s0 + $0x158] sm:$0xf0] }
  0x15   :  { %v1395_v62 = vor.u32 %v1688_v58, %v1392_v59  ;;  %v1382_v63 = vld [vmem:[%s2497_s0 + $0x30] sm:$0xf]  ;;  %v1687_v0 = vld [vmem:[%s2497_s0 + $0x34] sm:$0xf0]  ;;  %v1531_v3 = vor.u32 %v1722_v60, %v1528_v61  ;;  %v1690_v6 = vld [vmem:[%s2497_s0 + $0x54] sm:$0xf] }
  0x16   :  { %682 = vmatpush.bf16.msra.mxu0 %v1746_v19  ;;  %1949 = vmatpush.bf16.msra.mxu2 %v1746_v19  ;;  %v1510_v1 = vld [vmem:[%s2497_s0 + $0x130] sm:$0xf]  ;;  %v1719_v2 = vld [vmem:[%s2497_s0 + $0x134] sm:$0xf0]  ;;  %v1383_v4 = vor.u32 %v1687_v0, %v1382_v63  ;;  %v1400_v7 = vld [vmem:[%s2497_s0 + $0x58] sm:$0xf0] }
  0x17   :  { %v1511_v5 = vor.u32 %v1719_v2, %v1510_v1  ;;  %v1724_v8 = vld [vmem:[%s2497_s0 + $0x164] sm:$0xf]  ;;  %v1536_v9 = vld [vmem:[%s2497_s0 + $0x168] sm:$0xf0]  ;;  %v1403_v10 = vor.u32 %v1690_v6, %v1400_v7  ;;  %v1390_v11 = vld [vmem:[%s2497_s0 + $0x40] sm:$0xf] }
  0x18   :  { %v1689_v12 = vld [vmem:[%s2497_s0 + $0x44] sm:$0xf0]  ;;  %v1518_v13 = vld [vmem:[%s2497_s0 + $0x140] sm:$0xf]  ;;  %v1539_v15 = vor.u32 %v1724_v8, %v1536_v9  ;;  %v1692_v18 = vld [vmem:[%s2497_s0 + $0x64] sm:$0xf] }
  0x19   :  { %v1721_v14 = vld [vmem:[%s2497_s0 + $0x144] sm:$0xf0]  ;;  %v1391_v16 = vor.u32 %v1689_v12, %v1390_v11  ;;  %v1408_v19 = vld [vmem:[%s2497_s0 + $0x68] sm:$0xf0]  ;;  %v1544_v21 = vld [vmem:[%s2497_s0 + $0x178] sm:$0xf0] }
  0x1a   :  { %683 = vmatpush.bf16.msra.mxu0 %v1745_v20  ;;  %1950 = vmatpush.bf16.msra.mxu2 %v1745_v20  ;;  %v1519_v17 = vor.u32 %v1721_v14, %v1518_v13  ;;  %v1726_v20 = vld [vmem:[%s2497_s0 + $0x174] sm:$0xf]  ;;  %v1411_v22 = vor.u32 %v1692_v18, %v1408_v19  ;;  %v1398_v23 = vld [vmem:[%s2497_s0 + $0x50] sm:$0xf]  ;;  %v1691_v24 = vld [vmem:[%s2497_s0 + $0x54] sm:$0xf0] }
  0x1b   :  { %v1547_v27 = vor.u32 %v1726_v20, %v1544_v21  ;;  %v1399_v28 = vor.u32 %v1691_v24, %v1398_v23  ;;  %v1694_v30 = vld [vmem:[%s2497_s0 + $0x74] sm:$0xf]  ;;  %v1406_v35 = vld [vmem:[%s2497_s0 + $0x60] sm:$0xf]  ;;  %v1693_v36 = vld [vmem:[%s2497_s0 + $0x64] sm:$0xf0] }
  0x1c   :  { %v1534_v37 = vld [vmem:[%s2497_s0 + $0x160] sm:$0xf]  ;;  %v1407_v40 = vor.u32 %v1693_v36, %v1406_v35  ;;  %v1696_v42 = vld [vmem:[%s2497_s0 + $0x84] sm:$0xf]  ;;  %v1414_v47 = vld [vmem:[%s2497_s0 + $0x70] sm:$0xf] }
  0x1d   :  { %v1695_v48 = vld [vmem:[%s2497_s0 + $0x74] sm:$0xf0]  ;;  %v1432_v58 = vld [vmem:[%s2497_s0 + $0x98] sm:$0xf0]  ;;  %v1732_v59 = vld [vmem:[%s2497_s0 + $0x1a4] sm:$0xf] }
  0x1e   :  { %684 = vmatpush.bf16.msra.mxu0 %v1744_v26  ;;  %1951 = vmatpush.bf16.msra.mxu2 %v1744_v26  ;;  %v1723_v26 = vld [vmem:[%s2497_s0 + $0x154] sm:$0xf0]  ;;  %v1415_v53 = vor.u32 %v1695_v48, %v1414_v47  ;;  %v1568_v60 = vld [vmem:[%s2497_s0 + $0x1a8] sm:$0xf0]  ;;  %v1697_v63 = vld [vmem:[%s2497_s0 + $0x84] sm:$0xf0] }
  0x1f   :  { %1649 = vmatmul.msk.bf16.gmra.mxu1 %vm573_vm2, %v1371_v25  ;;  %1666 = vmatmul.msk.bf16.gmra.mxu3 %vm573_vm2, %v1507_v31  ;;  %v1526_v25 = vld [vmem:[%s2497_s0 + $0x150] sm:$0xf]  ;;  %v1416_v31 = vld [vmem:[%s2497_s0 + $0x78] sm:$0xf0]  ;;  %v1727_v51 = vld [vmem:[%s2497_s0 + $0x174] sm:$0xf0] }
  0x20   :  { %v1527_v29 = vor.u32 %v1723_v26, %v1526_v25  ;;  %v1419_v34 = vor.u32 %v1694_v30, %v1416_v31  ;;  %v1550_v2 = vld [vmem:[%s2497_s0 + $0x180] sm:$0xf]  ;;  %v1700_v14 = vld [vmem:[%s2497_s0 + $0xa4] sm:$0xf]  ;;  %v1430_v20 = vld [vmem:[%s2497_s0 + $0x90] sm:$0xf] }
  0x21   :  { %685 = vmatmul.bf16.vlgmr.msra.gmra.mxu0 %v1359_v32  ;;  %765 = vmatmul.bf16.vlgmr.msra.gmra.mxu2 %v1487_v33  ;;  %v1728_v32 = vld [vmem:[%s2497_s0 + $0x184] sm:$0xf]  ;;  %v1552_v33 = vld [vmem:[%s2497_s0 + $0x188] sm:$0xf0]  ;;  %v1699_v21 = vld [vmem:[%s2497_s0 + $0x94] sm:$0xf0] }
  0x22   :  { %v1555_v39 = vor.u32 %v1728_v32, %v1552_v33  ;;  %v1558_v24 = vld [vmem:[%s2497_s0 + $0x190] sm:$0xf]  ;;  %v1731_v25 = vld [vmem:[%s2497_s0 + $0x194] sm:$0xf0]  ;;  %v1566_v47 = vld [vmem:[%s2497_s0 + $0x1a0] sm:$0xf] }
  0x23   :  { %v1559_v30 = vor.u32 %v1731_v25, %v1558_v24  ;;  %v1733_v48 = vld [vmem:[%s2497_s0 + $0x1a4] sm:$0xf0] }
  0x2f   :  { %1650 = vmatmul.msk.bf16.gmra.mxu1 %vm573_vm2, %v1379_v38  ;;  %1667 = vmatmul.msk.bf16.gmra.mxu3 %vm573_vm2, %v1515_v43  ;;  %v1725_v38 = vld [vmem:[%s2497_s0 + $0x164] sm:$0xf0]  ;;  %v1424_v43 = vld [vmem:[%s2497_s0 + $0x88] sm:$0xf0] }
  0x30   :  { %v1535_v41 = vor.u32 %v1725_v38, %v1534_v37  ;;  %v1427_v46 = vor.u32 %v1696_v42, %v1424_v43  ;;  %v1702_v37 = vld [vmem:[%s2497_s0 + $0xb4] sm:$0xf]  ;;  %v1448_v38 = vld [vmem:[%s2497_s0 + $0xb8] sm:$0xf0]  ;;  %v1438_v43 = vld [vmem:[%s2497_s0 + $0xa0] sm:$0xf] }
  0x31   :  { %690 = vmatmul.bf16.gmra.mxu0 %v1367_v44  ;;  %770 = vmatmul.bf16.gmra.mxu2 %v1495_v45  ;;  %v1730_v44 = vld [vmem:[%s2497_s0 + $0x194] sm:$0xf]  ;;  %v1560_v45 = vld [vmem:[%s2497_s0 + $0x198] sm:$0xf0]  ;;  %v1451_v42 = vor.u32 %v1702_v37, %v1448_v38  ;;  %v1582_v38 = vld [vmem:[%s2497_s0 + $0x1c0] sm:$0xf] }
  0x32   :  { %v1563_v52 = vor.u32 %v1730_v44, %v1560_v45  ;;  %v1701_v44 = vld [vmem:[%s2497_s0 + $0xa4] sm:$0xf0] }
  0x3f   :  { %1651 = vmatmul.msk.bf16.gmra.mxu1 %vm573_vm2, %v1387_v50  ;;  %1668 = vmatmul.msk.bf16.gmra.mxu3 %vm573_vm2, %v1523_v55  ;;  %v1542_v50 = vld [vmem:[%s2497_s0 + $0x170] sm:$0xf] }
  0x40   :  { %v1543_v54 = vor.u32 %v1727_v51, %v1542_v50  ;;  %v1439_v51 = vor.u32 %v1701_v44, %v1438_v43 }
  0x41   :  { %695 = vmatmul.bf16.gmra.mxu0 %v1375_v56  ;;  %775 = vmatmul.bf16.gmra.mxu2 %v1503_v57  ;;  %v1698_v57 = vld [vmem:[%s2497_s0 + $0x94] sm:$0xf] }
  0x42   :  { %v1435_v61 = vor.u32 %v1698_v57, %v1432_v58 }
  0x4f   :  { %1652 = vmatmul.msk.bf16.gmra.mxu1 %vm573_vm2, %v1395_v62  ;;  %1669 = vmatmul.msk.bf16.gmra.mxu3 %vm573_vm2, %v1531_v3  ;;  %v1422_v62 = vld [vmem:[%s2497_s0 + $0x80] sm:$0xf]  ;;  %v1729_v3 = vld [vmem:[%s2497_s0 + $0x184] sm:$0xf0] }
  0x50   :  { %v1551_v7 = vor.u32 %v1729_v3, %v1550_v2  ;;  %v1592_v2 = vld [vmem:[%s2497_s0 + $0x1d8] sm:$0xf0] }
  0x51   :  { %700 = vmatmul.bf16.gmra.mxu0 %v1383_v4  ;;  %780 = vmatmul.bf16.gmra.mxu2 %v1511_v5  ;;  %v1571_v4 = vor.u32 %v1732_v59, %v1568_v60  ;;  %v1423_v5 = vor.u32 %v1697_v63, %v1422_v62 }
  0x5f   :  { %1653 = vmatmul.msk.bf16.gmra.mxu1 %vm573_vm2, %v1403_v10  ;;  %1670 = vmatmul.msk.bf16.gmra.mxu3 %vm573_vm2, %v1539_v15  ;;  %v1440_v15 = vld [vmem:[%s2497_s0 + $0xa8] sm:$0xf0] }
  0x60   :  { %v1443_v19 = vor.u32 %v1700_v14, %v1440_v15 }
  0x61   :  { %705 = vmatmul.bf16.gmra.mxu0 %v1391_v16  ;;  %785 = vmatmul.bf16.gmra.mxu2 %v1519_v17  ;;  %v1734_v16 = vld [vmem:[%s2497_s0 + $0x1b4] sm:$0xf]  ;;  %v1576_v17 = vld [vmem:[%s2497_s0 + $0x1b8] sm:$0xf0] }
  0x62   :  { %v1579_v26 = vor.u32 %v1734_v16, %v1576_v17 }
  0x6f   :  { %1654 = vmatmul.msk.bf16.gmra.mxu1 %vm573_vm2, %v1411_v22  ;;  %1671 = vmatmul.msk.bf16.gmra.mxu3 %vm573_vm2, %v1547_v27 }
  0x71   :  { %710 = vmatmul.bf16.gmra.mxu0 %v1399_v28  ;;  %790 = vmatmul.bf16.gmra.mxu2 %v1527_v29  ;;  %v1431_v28 = vor.u32 %v1699_v21, %v1430_v20 }
  0x7f   :  { %1655 = vmatmul.msk.bf16.gmra.mxu1 %vm573_vm2, %v1419_v34  ;;  %1672 = vmatmul.msk.bf16.gmra.mxu3 %vm573_vm2, %v1555_v39  ;;  %v1736_v39 = vld [vmem:[%s2497_s0 + $0x1c4] sm:$0xf] }
  0x81   :  { %715 = vmatmul.bf16.gmra.mxu0 %v1407_v40  ;;  %795 = vmatmul.bf16.gmra.mxu2 %v1535_v41  ;;  %v1584_v40 = vld [vmem:[%s2497_s0 + $0x1c8] sm:$0xf0] }
  0x8c   :  { %v855_v49 = vpop.f32.mrf.mxu1 }
  0x8f   :  { %1656 = vmatmul.msk.bf16.gmra.mxu1 %vm573_vm2, %v1427_v46  ;;  %1673 = vmatmul.msk.bf16.gmra.mxu3 %vm573_vm2, %v1563_v52 }
  0x91   :  { %720 = vmatmul.bf16.gmra.mxu0 %v1415_v53  ;;  %800 = vmatmul.bf16.gmra.mxu2 %v1543_v54 }
  0x92   :  { %v2255_v55 = vpop.f32.mrf.mxu3 }
  0x94   :  { %v857_v56 = vpop.f32.mrf.mxu1 }
  0x9a   :  { %v2275_v0 = vpop.f32.mrf.mxu3 }
  0x9c   :  { %v860_v1 = vpop.f32.mrf.mxu1 }
  0x9e   :  { %v686_v6 = vpop.f32.mrf.mxu0 }
  0x9f   :  { %1657 = vmatmul.msk.bf16.gmra.mxu1 %vm573_vm2, %v1435_v61  ;;  %1674 = vmatmul.msk.bf16.gmra.mxu3 %vm573_vm2, %v1571_v4  ;;  %v856_v12 = vadd.f32 %v855_v49, %v686_v6  ;;  %v1587_v49 = vor.u32 %v1736_v39, %v1584_v40  ;;  %v1703_v6 = vld [vmem:[%s2497_s0 + $0xb4] sm:$0xf0]  ;;  %v1737_v39 = vld [vmem:[%s2497_s0 + $0x1c4] sm:$0xf0] }
  0xa1   :  { %725 = vmatmul.bf16.gmra.mxu0 %v1423_v5  ;;  %805 = vmatmul.bf16.gmra.mxu2 %v1551_v7  ;;  %v1446_v5 = vld [vmem:[%s2497_s0 + $0xb0] sm:$0xf] }
  0xa2   :  { %v2285_v8 = vpop.f32.mrf.mxu3  ;;  %v1447_v15 = vor.u32 %v1703_v6, %v1446_v5 }
  0xa4   :  { %v862_v9 = vpop.f32.mrf.mxu1  ;;  %v2287_v10 = vpop.f32.mrf.mxu2 }
  0xa6   :  { %v688_v11 = vpop.f32.mrf.mxu0 }
  0xa7   :  { %v858_v13 = vadd.f32 %v857_v56, %v688_v11  ;;  %v1567_v56 = vor.u32 %v1733_v48, %v1566_v47  ;;  %v1574_v11 = vld [vmem:[%s2497_s0 + $0x1b0] sm:$0xf]  ;;  %v1583_v47 = vor.u32 %v1737_v39, %v1582_v38 }
  0xa9   :  { %v1756_v18 = vpack.c.bf16 %v858_v13, %v856_v12  ;;  %v1735_v12 = vld [vmem:[%s2497_s0 + $0x1b4] sm:$0xf0] }
  0xaa   :  { %v2307_v22 = vpop.f32.mrf.mxu3 }
  0xab   :  { %1757 = vst [vmem:[#allocation3] sm:$0xff] %v1756_v18  }
  0xac   :  { %v865_v23 = vpop.f32.mrf.mxu1  ;;  %v2315_v27 = vpop.f32.mrf.mxu2 }
  0xae   :  { %v691_v29 = vpop.f32.mrf.mxu0 }
  0xaf   :  { %1658 = vmatmul.msk.bf16.gmra.mxu1 %vm573_vm2, %v1443_v19  ;;  %1675 = vmatmul.msk.bf16.gmra.mxu3 %vm573_vm2, %v1579_v26  ;;  %v861_v35 = vadd.f32 %v860_v1, %v691_v29  ;;  %v1738_v1 = vld [vmem:[%s2497_s0 + $0x1d4] sm:$0xf]  ;;  %v1575_v19 = vor.u32 %v1735_v12, %v1574_v11  ;;  %v1740_v29 = vld [vmem:[%s2497_s0 + $0x1e4] sm:$0xf] }
  0xb0   :  { %v1595_v13 = vor.u32 %v1738_v1, %v1592_v2  ;;  %v1739_v1 = vld [vmem:[%s2497_s0 + $0x1d4] sm:$0xf0] }
  0xb1   :  { %730 = vmatmul.bf16.gmra.mxu0 %v1431_v28  ;;  %810 = vmatmul.bf16.gmra.mxu2 %v1559_v30  ;;  %v1600_v30 = vld [vmem:[%s2497_s0 + $0x1e8] sm:$0xf0] }
  0xb2   :  { %v2319_v31 = vpop.f32.mrf.mxu3  ;;  %v1603_v40 = vor.u32 %v1740_v29, %v1600_v30 }
  0xb4   :  { %v867_v32 = vpop.f32.mrf.mxu1  ;;  %v771_v33 = vpop.f32.mrf.mxu2 }
  0xb5   :  { %v941_v52 = vadd.f32 %v2255_v55, %v771_v33  ;;  %v1704_v55 = vld [vmem:[%s2497_s0 + $0xc4] sm:$0xf] }
  0xb6   :  { %v693_v34 = vpop.f32.mrf.mxu0 }
  0xb7   :  { %v863_v36 = vadd.f32 %v862_v9, %v693_v34  ;;  %v1454_v34 = vld [vmem:[%s2497_s0 + $0xc0] sm:$0xf] }
  0xb9   :  { %v1761_v41 = vpack.c.bf16 %v863_v36, %v861_v35  ;;  %v1705_v35 = vld [vmem:[%s2497_s0 + $0xc4] sm:$0xf0] }
  0xba   :  { %v2339_v45 = vpop.f32.mrf.mxu3 }
  0xbb   :  { %1913 = vst [vmem:[#allocation3 + $0x8] sm:$0xff] %v1761_v41  }
  0xbc   :  { %v870_v46 = vpop.f32.mrf.mxu1  ;;  %v773_v50 = vpop.f32.mrf.mxu2 }
  0xbd   :  { %v943_v53 = vadd.f32 %v2275_v0, %v773_v50  ;;  %v1456_v0 = vld [vmem:[%s2497_s0 + $0xc8] sm:$0xf0] }
  0xbe   :  { %v696_v54 = vpop.f32.mrf.mxu0  ;;  %v1459_v4 = vor.u32 %v1704_v55, %v1456_v0  ;;  %v1590_v0 = vld [vmem:[%s2497_s0 + $0x1d0] sm:$0xf] }
  0xbf   :  { %1659 = vmatmul.msk.bf16.gmra.mxu1 %vm573_vm2, %v1451_v42  ;;  %1676 = vmatmul.msk.bf16.gmra.mxu3 %vm573_vm2, %v1587_v49  ;;  %v1841_v57 = vpack.c.bf16 %v943_v53, %v941_v52  ;;  %v866_v62 = vadd.f32 %v865_v23, %v696_v54  ;;  %v1455_v42 = vor.u32 %v1705_v35, %v1454_v34 }
  0xc0   :  { %v1591_v11 = vor.u32 %v1739_v1, %v1590_v0 }
  0xc1   :  { %735 = vmatmul.bf16.gmra.mxu0 %v1439_v51  ;;  %1929 = vst [vmem:[#allocation3 + $0x88] sm:$0xff] %v1841_v57   ;;  %815 = vmatmul.bf16.gmra.mxu2 %v1567_v56  ;;  %v1742_v56 = vld [vmem:[%s2497_s0 + $0x1f4] sm:$0xf]  ;;  %v1608_v57 = vld [vmem:[%s2497_s0 + $0x1f8] sm:$0xf0] }
  0xc2   :  { %v2351_v58 = vpop.f32.mrf.mxu3  ;;  %v1611_v2 = vor.u32 %v1742_v56, %v1608_v57 }
  0xc4   :  { %v872_v59 = vpop.f32.mrf.mxu1  ;;  %v776_v60 = vpop.f32.mrf.mxu2 }
  0xc5   :  { %v946_v16 = vadd.f32 %v2285_v8, %v776_v60  ;;  %v1706_v8 = vld [vmem:[%s2497_s0 + $0xd4] sm:$0xf] }
  0xc6   :  { %v698_v61 = vpop.f32.mrf.mxu0 }
  0xc7   :  { %v868_v63 = vadd.f32 %v867_v32, %v698_v61  ;;  %v1462_v61 = vld [vmem:[%s2497_s0 + $0xd0] sm:$0xf] }
  0xc9   :  { %v1766_v3 = vpack.c.bf16 %v868_v63, %v866_v62  ;;  %v1707_v62 = vld [vmem:[%s2497_s0 + $0xd4] sm:$0xf0] }
  0xca   :  { %v2371_v7 = vpop.f32.mrf.mxu3 }
  0xcb   :  { %1914 = vst [vmem:[#allocation3 + $0x10] sm:$0xff] %v1766_v3  }
  0xcc   :  { %v875_v9 = vpop.f32.mrf.mxu1  ;;  %v778_v14 = vpop.f32.mrf.mxu2 }
  0xcd   :  { %v948_v17 = vadd.f32 %v2307_v22, %v778_v14  ;;  %v1464_v22 = vld [vmem:[%s2497_s0 + $0xd8] sm:$0xf0] }
  0xce   :  { %v701_v18 = vpop.f32.mrf.mxu0  ;;  %v1467_v33 = vor.u32 %v1706_v8, %v1464_v22 }
  0xcf   :  { %1660 = vmatmul.msk.bf16.gmra.mxu1 %vm573_vm2, %v1459_v4  ;;  %1677 = vmatmul.msk.bf16.gmra.mxu3 %vm573_vm2, %v1595_v13  ;;  %v1846_v20 = vpack.c.bf16 %v948_v17, %v946_v16  ;;  %v871_v26 = vadd.f32 %v870_v46, %v701_v18  ;;  %v1463_v4 = vor.u32 %v1707_v62, %v1462_v61 }
  0xd1   :  { %740 = vmatmul.bf16.gmra.mxu0 %v1447_v15  ;;  %1930 = vst [vmem:[#allocation3 + $0x90] sm:$0xff] %v1846_v20   ;;  %820 = vmatmul.bf16.gmra.mxu2 %v1575_v19 }
  0xd2   :  { %v2383_v21 = vpop.f32.mrf.mxu3 }
  0xd4   :  { %v877_v23 = vpop.f32.mrf.mxu1  ;;  %v781_v24 = vpop.f32.mrf.mxu2 }
  0xd5   :  { %v951_v43 = vadd.f32 %v2319_v31, %v781_v24  ;;  %v1708_v31 = vld [vmem:[%s2497_s0 + $0xe4] sm:$0xf]  ;;  %v1709_v24 = vld [vmem:[%s2497_s0 + $0xe4] sm:$0xf0] }
  0xd6   :  { %v703_v25 = vpop.f32.mrf.mxu0 }
  0xd7   :  { %v873_v28 = vadd.f32 %v872_v59, %v703_v25 }
  0xd9   :  { %v1771_v32 = vpack.c.bf16 %v873_v28, %v871_v26  ;;  %v1598_v26 = vld [vmem:[%s2497_s0 + $0x1e0] sm:$0xf]  ;;  %v1741_v28 = vld [vmem:[%s2497_s0 + $0x1e4] sm:$0xf0] }
  0xda   :  { %v2403_v36 = vpop.f32.mrf.mxu3  ;;  %v1599_v34 = vor.u32 %v1741_v28, %v1598_v26 }
  0xdb   :  { %1915 = vst [vmem:[#allocation3 + $0x18] sm:$0xff] %v1771_v32  }
  0xdc   :  { %v880_v37 = vpop.f32.mrf.mxu1  ;;  %v783_v41 = vpop.f32.mrf.mxu2 }
  0xdd   :  { %v953_v44 = vadd.f32 %v2339_v45, %v783_v41  ;;  %v1472_v45 = vld [vmem:[%s2497_s0 + $0xe8] sm:$0xf0] }
  0xde   :  { %v706_v46 = vpop.f32.mrf.mxu0  ;;  %v1475_v60 = vor.u32 %v1708_v31, %v1472_v45 }
  0xdf   :  { %1661 = vmatmul.msk.bf16.gmra.mxu1 %vm573_vm2, %v1467_v33  ;;  %1678 = vmatmul.msk.bf16.gmra.mxu3 %vm573_vm2, %v1603_v40  ;;  %v1851_v48 = vpack.c.bf16 %v953_v44, %v951_v43  ;;  %v876_v53 = vadd.f32 %v875_v9, %v706_v46  ;;  %v1478_v46 = vld [vmem:[%s2497_s0 + $0xf0] sm:$0xf] }
  0xe1   :  { %745 = vmatmul.bf16.gmra.mxu0 %v1455_v42  ;;  %1931 = vst [vmem:[#allocation3 + $0x98] sm:$0xff] %v1851_v48   ;;  %825 = vmatmul.bf16.gmra.mxu2 %v1583_v47  ;;  %v1712_v42 = vld [vmem:[%s2497_s0 + $0x104] sm:$0xf]  ;;  %v1711_v47 = vld [vmem:[%s2497_s0 + $0xf4] sm:$0xf0] }
  0xe2   :  { %v2415_v49 = vpop.f32.mrf.mxu3 }
  0xe4   :  { %v882_v50 = vpop.f32.mrf.mxu1  ;;  %v786_v51 = vpop.f32.mrf.mxu2 }
  0xe5   :  { %v956_v5 = vadd.f32 %v2351_v58, %v786_v51  ;;  %v1710_v58 = vld [vmem:[%s2497_s0 + $0xf4] sm:$0xf]  ;;  %v1743_v51 = vld [vmem:[%s2497_s0 + $0x1f4] sm:$0xf0] }
  0xe6   :  { %v708_v52 = vpop.f32.mrf.mxu0 }
  0xe7   :  { %v878_v54 = vadd.f32 %v877_v23, %v708_v52  ;;  %v1470_v23 = vld [vmem:[%s2497_s0 + $0xe0] sm:$0xf] }
  0xe8   :  { %v1471_v22 = vor.u32 %v1709_v24, %v1470_v23 }
  0xe9   :  { %v1776_v59 = vpack.c.bf16 %v878_v54, %v876_v53  ;;  %v1479_v53 = vor.u32 %v1711_v47, %v1478_v46 }
  0xea   :  { %v2435_v63 = vpop.f32.mrf.mxu3 }
  0xeb   :  { %1916 = vst [vmem:[#allocation3 + $0x20] sm:$0xff] %v1776_v59  }
  0xec   :  { %v885_v55 = vpop.f32.mrf.mxu1  ;;  %v788_v3 = vpop.f32.mrf.mxu2 }
  0xed   :  { %v958_v6 = vadd.f32 %v2371_v7, %v788_v3  ;;  %v1480_v7 = vld [vmem:[%s2497_s0 + $0xf8] sm:$0xf0] }
  0xee   :  { %v711_v9 = vpop.f32.mrf.mxu0  ;;  %v1483_v20 = vor.u32 %v1710_v58, %v1480_v7 }
  0xef   :  { %1662 = vmatmul.msk.bf16.gmra.mxu1 %vm573_vm2, %v1475_v60  ;;  %1679 = vmatmul.msk.bf16.gmra.mxu3 %vm573_vm2, %v1611_v2  ;;  %v1856_v12 = vpack.c.bf16 %v958_v6, %v956_v5  ;;  %v881_v17 = vadd.f32 %v880_v37, %v711_v9 }
  0xf1   :  { %750 = vmatmul.bf16.gmra.mxu0 %v1463_v4  ;;  %1932 = vst [vmem:[#allocation3 + $0xa0] sm:$0xff] %v1856_v12   ;;  %830 = vmatmul.bf16.gmra.mxu2 %v1591_v11 }
  0xf2   :  { %v2447_v14 = vpop.f32.mrf.mxu3 }
  0xf4   :  { %v887_v13 = vpop.f32.mrf.mxu1  ;;  %v791_v15 = vpop.f32.mrf.mxu2 }
  0xf5   :  { %v961_v30 = vadd.f32 %v2383_v21, %v791_v15  ;;  %v1488_v21 = vld [vmem:[%s2497_s0 + $0x108] sm:$0xf0] }
  0xf6   :  { %v713_v16 = vpop.f32.mrf.mxu0  ;;  %v1491_v44 = vor.u32 %v1712_v42, %v1488_v21 }
  0xf7   :  { %v883_v18 = vadd.f32 %v882_v50, %v713_v16  ;;  %v1606_v50 = vld [vmem:[%s2497_s0 + $0x1f0] sm:$0xf]  ;;  %s1985_s0 = smov [#allocation3]  }
  0xf8   :  { %v1607_v56 = vor.u32 %v1743_v51, %v1606_v50  ;;  %s1342_s1 = sshll.u32 %s1985_s0, 4  ;;  %s1343_s1 = int_to_ptr.vmem [resolvable:$true] %s1342_s1 }
  0xf9   :  { %v1781_v19 = vpack.c.bf16 %v883_v18, %v881_v17 }
  0xfa   :  { %v972_v29 = vpop.f32.mrf.mxu3 }
  0xfb   :  { %1917 = vst [vmem:[#allocation3 + $0x28] sm:$0xff] %v1781_v19  }
  0xfc   :  { %v890_v25 = vpop.f32.mrf.mxu1  ;;  %v793_v8 = vpop.f32.mrf.mxu2 }
  0xfd   :  { %v963_v32 = vadd.f32 %v2403_v36, %v793_v8 }
  0xfe   :  { %v716_v33 = vpop.f32.mrf.mxu0 }
  0xff   :  { %1663 = vmatmul.msk.bf16.gmra.mxu1 %vm573_vm2, %v1483_v20  ;;  %v1861_v35 = vpack.c.bf16 %v963_v32, %v961_v30  ;;  %v886_v40 = vadd.f32 %v885_v55, %v716_v33 }
 0x101   :  { %755 = vmatmul.bf16.gmra.mxu0 %v1471_v22  ;;  %1933 = vst [vmem:[#allocation3 + $0xa8] sm:$0xff] %v1861_v35   ;;  %835 = vmatmul.bf16.gmra.mxu2 %v1599_v34 }
 0x102   :  { %v975_v36 = vpop.f32.mrf.mxu3 }
 0x104   :  { %v892_v37 = vpop.f32.mrf.mxu1  ;;  %v796_v38 = vpop.f32.mrf.mxu2 }
 0x105   :  { %v966_v54 = vadd.f32 %v2415_v49, %v796_v38 }
 0x106   :  { %v718_v39 = vpop.f32.mrf.mxu0 }
 0x107   :  { %v888_v41 = vadd.f32 %v887_v13, %v718_v39 }
 0x109   :  { %v1786_v43 = vpack.c.bf16 %v888_v41, %v886_v40 }
 0x10a   :  { %v977_v59 = vpop.f32.mrf.mxu3 }
 0x10b   :  { %1918 = vst [vmem:[#allocation3 + $0x30] sm:$0xff] %v1786_v43  }
 0x10c   :  { %v895_v48 = vpop.f32.mrf.mxu1  ;;  %v798_v52 = vpop.f32.mrf.mxu2 }
 0x10d   :  { %v968_v31 = vadd.f32 %v2435_v63, %v798_v52 }
 0x10e   :  { %v721_v45 = vpop.f32.mrf.mxu0 }
 0x10f   :  { %1664 = vmatmul.msk.bf16.gmra.mxu1 %vm573_vm2, %v1491_v44  ;;  %v1866_v57 = vpack.c.bf16 %v968_v31, %v966_v54  ;;  %v891_v55 = vadd.f32 %v890_v25, %v721_v45 }
 0x111   :  { %760 = vmatmul.bf16.gmra.mxu0 %v1479_v53  ;;  %1934 = vst [vmem:[#allocation3 + $0xb0] sm:$0xff] %v1866_v57   ;;  %840 = vmatmul.bf16.gmra.mxu2 %v1607_v56 }
 0x112   :  { %v980_v49 = vpop.f32.mrf.mxu3 }
 0x114   :  { %v897_v60 = vpop.f32.mrf.mxu1  ;;  %v801_v61 = vpop.f32.mrf.mxu2 }
 0x115   :  { %v971_v63 = vadd.f32 %v2447_v14, %v801_v61 }
 0x116   :  { %v723_v62 = vpop.f32.mrf.mxu0 }
 0x117   :  { %v893_v0 = vadd.f32 %v892_v37, %v723_v62 }
 0x119   :  { %v1791_v1 = vpack.c.bf16 %v893_v0, %v891_v55 }
 0x11a   :  { %v982_v12 = vpop.f32.mrf.mxu3 }
 0x11b   :  { %1919 = vst [vmem:[#allocation3 + $0x38] sm:$0xff] %v1791_v1  }
 0x11c   :  { %v900_v2 = vpop.f32.mrf.mxu1  ;;  %v803_v3 = vpop.f32.mrf.mxu2 }
 0x11d   :  { %v973_v4 = vadd.f32 %v972_v29, %v803_v3 }
 0x11e   :  { %v726_v5 = vpop.f32.mrf.mxu0 }
 0x11f   :  { %v1871_v6 = vpack.c.bf16 %v973_v4, %v971_v63  ;;  %v896_v15 = vadd.f32 %v895_v48, %v726_v5 }
 0x121   :  { %1935 = vst [vmem:[#allocation3 + $0xb8] sm:$0xff] %v1871_v6  }
 0x122   :  { %v985_v23 = vpop.f32.mrf.mxu3 }
 0x124   :  { %v902_v9 = vpop.f32.mrf.mxu1  ;;  %v806_v11 = vpop.f32.mrf.mxu2 }
 0x125   :  { %v976_v7 = vadd.f32 %v975_v36, %v806_v11 }
 0x126   :  { %v728_v13 = vpop.f32.mrf.mxu0 }
 0x127   :  { %v898_v16 = vadd.f32 %v897_v60, %v728_v13 }
 0x129   :  { %v1796_v17 = vpack.c.bf16 %v898_v16, %v896_v15 }
 0x12a   :  { %v987_v29 = vpop.f32.mrf.mxu3 }
 0x12b   :  { %1920 = vst [vmem:[#allocation3 + $0x40] sm:$0xff] %v1796_v17  }
 0x12c   :  { %v905_v18 = vpop.f32.mrf.mxu1  ;;  %v808_v58 = vpop.f32.mrf.mxu2 }
 0x12d   :  { %v978_v19 = vadd.f32 %v977_v59, %v808_v58 }
 0x12e   :  { %v731_v20 = vpop.f32.mrf.mxu0 }
 0x12f   :  { %v1876_v24 = vpack.c.bf16 %v978_v19, %v976_v7  ;;  %v901_v28 = vadd.f32 %v900_v2, %v731_v20 }
 0x131   :  { %1936 = vst [vmem:[#allocation3 + $0xc0] sm:$0xff] %v1876_v24  }
 0x132   :  { %v990_v39 = vpop.f32.mrf.mxu3 }
 0x134   :  { %v907_v14 = vpop.f32.mrf.mxu1  ;;  %v811_v25 = vpop.f32.mrf.mxu2 }
 0x135   :  { %v981_v33 = vadd.f32 %v980_v49, %v811_v25 }
 0x136   :  { %v733_v26 = vpop.f32.mrf.mxu0 }
 0x137   :  { %v903_v8 = vadd.f32 %v902_v9, %v733_v26 }
 0x139   :  { %v1801_v22 = vpack.c.bf16 %v903_v8, %v901_v28 }
 0x13a   :  { %v992_v46 = vpop.f32.mrf.mxu3 }
 0x13b   :  { %1921 = vst [vmem:[#allocation3 + $0x48] sm:$0xff] %v1801_v22  }
 0x13c   :  { %v910_v30 = vpop.f32.mrf.mxu1  ;;  %v813_v32 = vpop.f32.mrf.mxu2 }
 0x13d   :  { %v983_v34 = vadd.f32 %v982_v12, %v813_v32 }
 0x13e   :  { %v736_v35 = vpop.f32.mrf.mxu0 }
 0x13f   :  { %v1881_v37 = vpack.c.bf16 %v983_v34, %v981_v33  ;;  %v906_v42 = vadd.f32 %v905_v18, %v736_v35 }
 0x141   :  { %1937 = vst [vmem:[#allocation3 + $0xc8] sm:$0xff] %v1881_v37  }
 0x142   :  { %v995_v56 = vpop.f32.mrf.mxu3 }
 0x144   :  { %v912_v38 = vpop.f32.mrf.mxu1  ;;  %v816_v40 = vpop.f32.mrf.mxu2 }
 0x145   :  { %v986_v47 = vadd.f32 %v985_v23, %v816_v40 }
 0x146   :  { %v738_v41 = vpop.f32.mrf.mxu0 }
 0x147   :  { %v908_v21 = vadd.f32 %v907_v14, %v738_v41 }
 0x149   :  { %v1806_v36 = vpack.c.bf16 %v908_v21, %v906_v42 }
 0x14a   :  { %v997_v1 = vpop.f32.mrf.mxu3 }
 0x14b   :  { %1922 = vst [vmem:[#allocation3 + $0x50] sm:$0xff] %v1806_v36  }
 0x14c   :  { %v915_v43 = vpop.f32.mrf.mxu1  ;;  %v818_v44 = vpop.f32.mrf.mxu2 }
 0x14d   :  { %v988_v48 = vadd.f32 %v987_v29, %v818_v44 }
 0x14e   :  { %v741_v50 = vpop.f32.mrf.mxu0 }
 0x14f   :  { %v1886_v51 = vpack.c.bf16 %v988_v48, %v986_v47  ;;  %v911_v31 = vadd.f32 %v910_v30, %v741_v50 }
 0x151   :  { %1938 = vst [vmem:[#allocation3 + $0xd0] sm:$0xff] %v1886_v51  }
 0x152   :  { %v1000_v9 = vpop.f32.mrf.mxu3 }
 0x154   :  { %v917_v52 = vpop.f32.mrf.mxu1  ;;  %v821_v53 = vpop.f32.mrf.mxu2 }
 0x155   :  { %v991_v61 = vadd.f32 %v990_v39, %v821_v53 }
 0x156   :  { %v743_v54 = vpop.f32.mrf.mxu0 }
 0x157   :  { %v913_v45 = vadd.f32 %v912_v38, %v743_v54 }
 0x159   :  { %v1811_v57 = vpack.c.bf16 %v913_v45, %v911_v31 }
 0x15a   :  { %v1002_v58 = vpop.f32.mrf.mxu3 }
 0x15b   :  { %1923 = vst [vmem:[#allocation3 + $0x58] sm:$0xff] %v1811_v57  }
 0x15c   :  { %v920_v59 = vpop.f32.mrf.mxu1  ;;  %v823_v60 = vpop.f32.mrf.mxu2 }
 0x15d   :  { %v993_v62 = vadd.f32 %v992_v46, %v823_v60 }
 0x15e   :  { %v746_v55 = vpop.f32.mrf.mxu0 }
 0x15f   :  { %v1891_v0 = vpack.c.bf16 %v993_v62, %v991_v61  ;;  %v916_v63 = vadd.f32 %v915_v43, %v746_v55 }
 0x161   :  { %1939 = vst [vmem:[#allocation3 + $0xd8] sm:$0xff] %v1891_v0  }
 0x162   :  { %v1005_v8 = vpop.f32.mrf.mxu3 }
 0x164   :  { %v922_v2 = vpop.f32.mrf.mxu1  ;;  %v826_v49 = vpop.f32.mrf.mxu2 }
 0x165   :  { %v996_v12 = vadd.f32 %v995_v56, %v826_v49 }
 0x166   :  { %v748_v3 = vpop.f32.mrf.mxu0 }
 0x167   :  { %v918_v4 = vadd.f32 %v917_v52, %v748_v3 }
 0x169   :  { %v1816_v5 = vpack.c.bf16 %v918_v4, %v916_v63 }
 0x16a   :  { %v1007_v35 = vpop.f32.mrf.mxu3 }
 0x16b   :  { %1924 = vst [vmem:[#allocation3 + $0x60] sm:$0xff] %v1816_v5  }
 0x16c   :  { %v925_v6 = vpop.f32.mrf.mxu1  ;;  %v828_v11 = vpop.f32.mrf.mxu2 }
 0x16d   :  { %v998_v13 = vadd.f32 %v997_v1, %v828_v11 }
 0x16e   :  { %v751_v15 = vpop.f32.mrf.mxu0 }
 0x16f   :  { %v1896_v16 = vpack.c.bf16 %v998_v13, %v996_v12  ;;  %v921_v19 = vadd.f32 %v920_v59, %v751_v15 }
 0x171   :  { %1940 = vst [vmem:[#allocation3 + $0xe0] sm:$0xff] %v1896_v16  }
 0x172   :  { %v1010_v36 = vpop.f32.mrf.mxu3 }
 0x174   :  { %v927_v17 = vpop.f32.mrf.mxu1  ;;  %v831_v18 = vpop.f32.mrf.mxu2 }
 0x175   :  { %v1001_v25 = vadd.f32 %v1000_v9, %v831_v18 }
 0x176   :  { %v753_v7 = vpop.f32.mrf.mxu0 }
 0x177   :  { %v923_v20 = vadd.f32 %v922_v2, %v753_v7 }
 0x179   :  { %v1821_v23 = vpack.c.bf16 %v923_v20, %v921_v19 }
 0x17a   :  { %v1012_v54 = vpop.f32.mrf.mxu3 }
 0x17b   :  { %1925 = vst [vmem:[#allocation3 + $0x68] sm:$0xff] %v1821_v23  }
 0x17c   :  { %v930_v24 = vpop.f32.mrf.mxu1  ;;  %v833_v14 = vpop.f32.mrf.mxu2 }
 0x17d   :  { %v1003_v26 = vadd.f32 %v1002_v58, %v833_v14 }
 0x17e   :  { %v756_v28 = vpop.f32.mrf.mxu0 }
 0x17f   :  { %v1901_v22 = vpack.c.bf16 %v1003_v26, %v1001_v25  ;;  %v926_v33 = vadd.f32 %v925_v6, %v756_v28 }
 0x181   :  { %1941 = vst [vmem:[#allocation3 + $0xe8] sm:$0xff] %v1901_v22  }
 0x184   :  { %v932_v29 = vpop.f32.mrf.mxu1  ;;  %v836_v30 = vpop.f32.mrf.mxu2 }
 0x185   :  { %v1006_v40 = vadd.f32 %v1005_v8, %v836_v30 }
 0x186   :  { %v758_v32 = vpop.f32.mrf.mxu0 }
 0x187   :  { %v928_v34 = vadd.f32 %v927_v17, %v758_v32 }
 0x189   :  { %v1826_v37 = vpack.c.bf16 %v928_v34, %v926_v33 }
 0x18b   :  { %1926 = vst [vmem:[#allocation3 + $0x70] sm:$0xff] %v1826_v37  }
 0x18c   :  { %v935_v38 = vpop.f32.mrf.mxu1  ;;  %v838_v39 = vpop.f32.mrf.mxu2 }
 0x18d   :  { %v1008_v41 = vadd.f32 %v1007_v35, %v838_v39  ;;  %v936_v44 = vadd.f32 %v935_v38, %v2287_v10 }
 0x18e   :  { %v761_v42 = vpop.f32.mrf.mxu0 }
 0x18f   :  { %v1906_v21 = vpack.c.bf16 %v1008_v41, %v1006_v40  ;;  %v931_v51 = vadd.f32 %v930_v24, %v761_v42 }
 0x191   :  { %1942 = vst [vmem:[#allocation3 + $0xf0] sm:$0xff] %v1906_v21  }
 0x194   :  { %v937_v43 = vpop.f32.mrf.mxu1  ;;  %v841_v47 = vpop.f32.mrf.mxu2 }
 0x195   :  { %v938_v46 = vadd.f32 %v937_v43, %v2315_v27  ;;  %v1011_v45 = vadd.f32 %v1010_v36, %v841_v47 }
 0x196   :  { %v763_v50 = vpop.f32.mrf.mxu0 }
 0x197   :  { %v1836_v48 = vpack.c.bf16 %v938_v46, %v936_v44  ;;  %v933_v52 = vadd.f32 %v932_v29, %v763_v50 }
 0x199   :  { %1928 = vst [vmem:[#allocation3 + $0x80] sm:$0xff] %v1836_v48   ;;  %v1831_v53 = vpack.c.bf16 %v933_v52, %v931_v51 }
 0x19b   :  { %1927 = vst [vmem:[#allocation3 + $0x78] sm:$0xff] %v1831_v53  }
 0x19c   :  { %v843_v31 = vpop.f32.mrf.mxu2 }
 0x19d   :  { %v1013_v10 = vadd.f32 %v1012_v54, %v843_v31 }
 0x19f   :  { %v1911_v27 = vpack.c.bf16 %v1013_v10, %v1011_v45 }
 0x1a1   :  { %1943 = vst [vmem:[#allocation3 + $0xf8] sm:$0xff] %v1911_v27  }
 0x1a2   :  { %1350 = dma.vmem_to_hbm [thread:$0]  %s1343_s1, 4096, %s1345_s27, [#allocation4], %s1986_s28, %s1986_s28, %s1987_s29  }
 0x1a3   :  { %1982 = dma.done.wait [#allocation4], 4096  }
 0x1a4   :  { %1983 = vsyncadd [#allocation4], 4294963200 }
 0x1a5   :  { %1355 = vsyncpa [#allocation4], 1 }

</bundles_post_ra>
